<compile_context>
chip_gen: v7x
topology: tpu7x:2x2x1
jax: 0.10.0
libtpu: 0.0.40
codegen_flags: <defaults>
</compile_context>

<pallas_src>
import jax
import jax.numpy as jnp
from jax.experimental import pallas as pl
from jax.experimental.pallas import tpu as pltpu


def _full_batch_norm_kernel(x_ref, stats_ref, o_ref):
    # x_ref:     (TM, TD) tile of the input
    # stats_ref: (2, TD)  float32; row 0 = inv_std, row 1 = mean * inv_std
    # o_ref:     (TM, TD) output tile
    x = x_ref[...].astype(jnp.float32)
    stats = stats_ref[...]
    inv_std = stats[0:1, :]        # (1, TD), broadcasts over rows
    shift = stats[1:2, :]          # (1, TD)
    o_ref[...] = (x * inv_std - shift).astype(o_ref.dtype)


def _round_up(v, m):
    return ((v + m - 1) // m) * m


def _vmem_capacity_bytes():
    """Physical VMEM of the local chip; conservative fallback = 64 MiB (v7x)."""
    try:
        info = pltpu.get_tpu_info()
        for name in ("vmem_capacity_bytes", "vmem_bytes", "vmem_size_bytes"):
            v = getattr(info, name, None)
            if v:
                return int(v)
    except Exception:
        pass
    return 64 << 20


def _num_tensorcores():
    """TensorCores per chip; conservative fallback = 1 (v5e/v6e)."""
    try:
        dev = jax.devices()[0]
        for name in ("num_cores", "core_count"):
            v = getattr(dev, name, None)
            if v:
                return int(v)
    except Exception:
        pass
    return 1


def _choose_td(D, max_td):
    """Lane-dense feature tile: full D, a multiple of 128 dividing D, or max_td."""
    if D <= max_td:
        return D
    td_cap = max(128, (max_td // 128) * 128)
    for cand in range(td_cap, 0, -128):
        if D % cand == 0:
            return cand
    return td_cap


def full_batch_norm(x, var, mean, *, max_td=2048):
    """(x - mean) / sqrt(var + 1e-5), HBM-bandwidth-bound hot path in Pallas."""
    N, D = x.shape
    itemsize = jnp.dtype(x.dtype).itemsize

    # ---- buffers (done once at module init in PyTorch) -> plain JAX glue ----
    # Keep statistics in f32 so bf16 inputs still get f32-accurate normalization.
    inv_std = 1.0 / jnp.sqrt(var.astype(jnp.float32) + 1e-5)
    shift = mean.astype(jnp.float32) * inv_std
    stats = jnp.stack([inv_std, shift], axis=0)          # (2, D) float32

    # ---- generation-aware sizing -------------------------------------------
    vmem_phys = _vmem_capacity_bytes()
    if vmem_phys >= (100 << 20):          # v5e / v6e: 128 MiB VMEM
        target_tile_bytes = 6 << 20
        vmem_cap = 96 << 20
    else:                                 # v7x: 64 MiB VMEM
        target_tile_bytes = 4 << 20
        vmem_cap = 48 << 20

    # Sublane pack: 8 rows for f32, 16 for bf16, 32 for 8-bit dtypes.
    pack = max(8, 32 // itemsize)

    # Feature tile: lane-dense (whole D, a divisor of D, or a 128-multiple).
    td = _choose_td(D, max_td)

    # Row tile: aim for ~target_tile_bytes per x tile, rounded to the pack.
    tm = target_tile_bytes // max(1, td * itemsize)
    tm = max(pack, (tm // pack) * pack)
    tm = min(tm, _round_up(N, pack))      # never exceed (padded) N

    grid_d = pl.cdiv(D, td)
    grid_n = pl.cdiv(N, tm)

    # Megacore: only split rows when there are >= 2 TensorCores AND the total
    # grid would otherwise have a single step (v5e/v6e have 1 TC -> skip).
    num_cores = _num_tensorcores()
    if num_cores > 1 and grid_d * grid_n < 2 and N > pack:
        tm = max(pack, _round_up(pl.cdiv(N, num_cores), pack))
        tm = min(tm, _round_up(N, pack))
        grid_n = pl.cdiv(N, tm)

    # Grid order (features, rows): rows iterate fastest, so the stats block
    # index is constant across the inner loop and writeback stays in one slab.
    grid = (grid_d, grid_n)

    # ---- explicit VMEM budget: double-buffered x + out tiles, stats rows ----
    tile_bytes = tm * td * itemsize
    stats_bytes = 2 * td * 4
    vmem_limit = 4 * tile_bytes + 2 * stats_bytes + (4 << 20)
    vmem_limit = int(min(max(vmem_limit, 16 << 20), vmem_cap))

    return pl.pallas_call(
        _full_batch_norm_kernel,
        out_shape=jax.ShapeDtypeStruct((N, D), x.dtype),
        grid_spec=pltpu.PrefetchScalarGridSpec(
            num_scalar_prefetch=0,
            grid=grid,
            in_specs=[
                pl.BlockSpec((tm, td), lambda j, i: (i, j)),   # x tile
                pl.BlockSpec((2, td), lambda j, i: (0, j)),    # packed stats
            ],
            out_specs=pl.BlockSpec((tm, td), lambda j, i: (i, j)),
        ),
        compiler_params=pltpu.CompilerParams(
            dimension_semantics=("parallel", "parallel"),
            vmem_limit_bytes=vmem_limit,
        ),
    )(x, stats)


def _reference(x, var, mean):
    inv_std = 1.0 / jnp.sqrt(var.astype(jnp.float32) + 1e-5)
    out = (x.astype(jnp.float32) - mean.astype(jnp.float32)[None, :]) * inv_std[None, :]
    return out.astype(x.dtype)


if __name__ == "__main__":
    key = jax.random.PRNGKey(0)
    k_x, k_var, k_mean, k_x2 = jax.random.split(key, 4)

    # Small (batch, features) consistent with eval_linear usage.
    N, D = 8, 256
    x = jax.random.normal(k_x, (N, D), dtype=jnp.float32)
    var = jax.random.uniform(k_var, (D,), dtype=jnp.float32, minval=0.1, maxval=2.0)
    mean = jax.random.normal(k_mean, (D,), dtype=jnp.float32)

    out = jax.block_until_ready(full_batch_norm(x, var, mean))
    ref = _reference(x, var, mean)
    assert jnp.allclose(out, ref, atol=1e-5, rtol=1e-5), "mismatch vs reference (N=8)"

    # Exercise the multi-step row grid + remainder-row-tile path.
    N2 = 20
    x2 = jax.random.normal(k_x2, (N2, D), dtype=jnp.float32)
    out2 = jax.block_until_ready(full_batch_norm(x2, var, mean))
    ref2 = _reference(x2, var, mean)
    assert jnp.allclose(out2, ref2, atol=1e-5, rtol=1e-5), "mismatch vs reference (N=20)"

    print("KERNEL_OK")
</pallas_src>

<mosaic_0001>
module attributes {stable_mosaic.version = 11 : i64} {
  func.func @_full_batch_norm_kernel(%arg0: i32, %arg1: i32, %arg2: memref<8x256xf32, #tpu.memory_space<vmem>>, %arg3: memref<2x256xf32, #tpu.memory_space<vmem>>, %arg4: memref<8x256xf32, #tpu.memory_space<vmem>>) attributes {dimension_semantics = [#tpu.dimension_semantics<parallel>, #tpu.dimension_semantics<parallel>], iteration_bounds = array<i64: 1, 1>, scalar_prefetch = 0 : i64, scratch_operands = 0 : i64, tpu.core_type = #tpu.core_type<tc>, window_params = [{transform_indices = @transform_0, window_bounds = array<i64: 8, 256>}, {transform_indices = @transform_1, window_bounds = array<i64: 2, 256>}, {transform_indices = @transform_2, window_bounds = array<i64: 8, 256>}]} {
    %c0 = arith.constant 0 : index
    %c0_0 = arith.constant 0 : index
    %0 = vector.load %arg2[%c0, %c0_0] : memref<8x256xf32, #tpu.memory_space<vmem>>, vector<8x256xf32>
    %c0_1 = arith.constant 0 : index
    %c0_2 = arith.constant 0 : index
    %1 = vector.load %arg3[%c0_1, %c0_2] : memref<2x256xf32, #tpu.memory_space<vmem>>, vector<2x256xf32>
    %2 = vector.extract_strided_slice %1 {offsets = [0, 0], sizes = [1, 256], strides = [1, 1]} : vector<2x256xf32> to vector<1x256xf32>
    %3 = vector.extract_strided_slice %1 {offsets = [1, 0], sizes = [1, 256], strides = [1, 1]} : vector<2x256xf32> to vector<1x256xf32>
    %4 = vector.broadcast %2 : vector<1x256xf32> to vector<8x256xf32>
    %5 = arith.mulf %0, %4 : vector<8x256xf32>
    %6 = vector.broadcast %3 : vector<1x256xf32> to vector<8x256xf32>
    %7 = arith.subf %5, %6 : vector<8x256xf32>
    %c0_3 = arith.constant 0 : index
    %c0_4 = arith.constant 0 : index
    %8 = vector.load %arg4[%c0_3, %c0_4] : memref<8x256xf32, #tpu.memory_space<vmem>>, vector<8x256xf32>
    tpu.vector_store %arg4[%c0_3, %c0_4], %7 {strides = array<i32>} : memref<8x256xf32, #tpu.memory_space<vmem>>, vector<8x256xf32>,
    return
  }
  func.func @transform_0(%arg0: i32, %arg1: i32) -> (i32, i32) {
    %c0_i32 = arith.constant 0 : i32
    return %arg1, %arg0 : i32, i32
  }
  func.func @transform_1(%arg0: i32, %arg1: i32) -> (i32, i32) {
    %c0_i32 = arith.constant 0 : i32
    %c0_i32_0 = arith.constant 0 : i32
    return %c0_i32, %arg0 : i32, i32
  }
  func.func @transform_2(%arg0: i32, %arg1: i32) -> (i32, i32) {
    %c0_i32 = arith.constant 0 : i32
    return %arg1, %arg0 : i32, i32
  }
}

</mosaic_0001>

<bundles_post_ra>
// kernel: tpu_custom_call.1
= control target key start
LH: loop header
LB: loop body
LE: loop exit
PB: predicated region body
PF: predicated region fallthrough
CT: control target
= control target key end

     0   :  { %7 = vsyncpa [#allocation3], 0  ;;  %s227_s0 = inlined_call_operand.hbm [shape: f32[8,256], index: 0, kind: input, shape index: {}]   ;;  %s228_s1 = inlined_call_operand.hbm [shape: f32[2,256], index: 1, kind: input, shape index: {}]   ;;  %s229_s2 = inlined_call_operand.hbm [shape: f32[8,256], index: 2, kind: output, shape index: {}]  }
   0x1   :  { %8 = vsyncpa [#allocation6], 0 }
   0x2   :  { %9 = vsyncpa [#allocation4], 0  ;;  %s173_s9 = smov [#allocation2]   ;;  %s174_s11 = smov [#allocation5]  }
   0x3   :  { %s16_s10 = sshll.u32 %s173_s9, 4  ;;  %s26_s12 = sshll.u32 %s174_s11, 4  ;;  %s17_s10 = int_to_ptr.vmem [resolvable:$true] %s16_s10  ;;  %s27_s12 = int_to_ptr.vmem [resolvable:$true] %s26_s12 }
   0x4   :  { %s101_s15 = scalar_lea.hbm %s227_s0, 256 }
   0x5   :  { %p102_p0 = scmp.ne.s32.totalorder %s227_s0, %s101_s15  ;;  %p105_p1 = scmp.lt.u32.totalorder %s101_s15, %s227_s0 }
   0x7   :  { %p107_p2 = pnand %p105_p1, %p102_p0 }
   0x9   :  { %110 = shalt.err (!%p107_p2)
}
   0xa   :  { %s111_s20 = scalar_lea.vmem %s17_s10, 256  ;;  %p116_p4 = scmp.lt.s32.totalorder %s17_s10, %s17_s10 }
   0xb   :  { %p112_p3 = scmp.ne.s32.totalorder %s17_s10, %s111_s20  ;;  %p117_p5 = scmp.lt.s32.totalorder %s111_s20, %s111_s20 }
   0xd   :  { %p118_p6 = por %p117_p5, %p116_p4 }
   0xf   :  { %p119_p7 = pnand %p118_p6, %p112_p3 }
  0x11   :  { %122 = shalt.err (!%p119_p7)
}
  0x12   :  { %19 = dma.hbm_to_vmem [thread:$0]  %s227_s0, 256, %s17_s10, [#allocation3]  }
  0x13   :  { %s123_s25 = scalar_lea.hbm %s228_s1, 64 }
  0x14   :  { %p124_p8 = scmp.ne.s32.totalorder %s228_s1, %s123_s25  ;;  %p127_p9 = scmp.lt.u32.totalorder %s123_s25, %s228_s1 }
  0x16   :  { %p129_p10 = pnand %p127_p9, %p124_p8 }
  0x18   :  { %132 = shalt.err (!%p129_p10)
}
  0x19   :  { %s133_s30 = scalar_lea.vmem %s27_s12, 64  ;;  %p138_p12 = scmp.lt.s32.totalorder %s27_s12, %s27_s12 }
  0x1a   :  { %p134_p11 = scmp.ne.s32.totalorder %s27_s12, %s133_s30  ;;  %p139_p13 = scmp.lt.s32.totalorder %s133_s30, %s133_s30 }
  0x1c   :  { %p140_p0 = por %p139_p13, %p138_p12 }
  0x1e   :  { %p141_p1 = pnand %p140_p0, %p134_p11 }
  0x20   :  { %144 = shalt.err (!%p141_p1)
}
  0x21   :  { %29 = dma.hbm_to_vmem [thread:$0]  %s228_s1, 64, %s27_s12, [#allocation6]  }
  0x22   :  { %167 = dma.done.wait [#allocation3], 256  }
  0x23   :  { %168 = vsyncadd [#allocation3], 4294967040 }
  0x24   :  { %169 = dma.done.wait [#allocation6], 64  }
  0x25   :  { %170 = vsyncadd [#allocation6], 4294967232  ;;  %v40_v0 = vlaneseq  ;;  %v38_v6 = vld [vmem:[#allocation5] sm:$0xf]  ;;  %v36_v11 = vld [vmem:[#allocation2] sm:$0xff]  ;;  %s175_s1 = smov [#allocation7]  }
  0x26   :  { %v37_v12 = vld [vmem:[#allocation2 + $0x8] sm:$0xff]  ;;  %s88_s4 = sshll.u32 %s175_s1, 4  ;;  %s89_s4 = int_to_ptr.vmem [resolvable:$true] %s88_s4 }
  0x27   :  { %v41_v1 = vshrl.u32 %v40_v0, 7  ;;  %s145_s5 = scalar_lea.vmem %s89_s4, 256  ;;  %p150_p3 = scmp.lt.s32.totalorder %s89_s4, %s89_s4 }
  0x28   :  { %p146_p2 = scmp.ne.s32.totalorder %s89_s4, %s145_s5  ;;  %p151_p4 = scmp.lt.s32.totalorder %s145_s5, %s145_s5 }
  0x29   :  { %v42_v2 = vsub.s32 0, %v41_v1  ;;  %v62_v3 = vsub.s32 1, %v41_v1  ;;  %v46_v4 = vsub.s32 2, %v41_v1  ;;  %v66_v5 = vsub.s32 3, %v41_v1 }
  0x2a   :  { %p152_p5 = por %p151_p4, %p150_p3 }
  0x2b   :  { %v43_v7 = vrot.slane %v38_v6, %v42_v2  ;;  %v63_v8 = vrot.slane %v38_v6, %v62_v3  ;;  %v47_v9 = vrot.slane %v38_v6, %v46_v4  ;;  %v67_v10 = vrot.slane %v38_v6, %v66_v5 }
  0x2c   :  { %p153_p6 = pnand %p152_p5, %p146_p2 }
  0x2d   :  { %v53_v13 = vrot.slane %v43_v7, %v42_v2  ;;  %v73_v14 = vrot.slane %v63_v8, %v62_v3  ;;  %v57_v15 = vrot.slane %v47_v9, %v42_v2  ;;  %v77_v16 = vrot.slane %v67_v10, %v62_v3 }
  0x2f   :  { %v58_v17 = vmul.f32 %v53_v13, %v36_v11  ;;  %v59_v18 = vmul.f32 %v57_v15, %v37_v12 }
  0x31   :  { %v78_v19 = vsub.f32 %v58_v17, %v73_v14  ;;  %v79_v20 = vsub.f32 %v59_v18, %v77_v16 }
  0x33   :  { %80 = vst [vmem:[#allocation7] sm:$0xff] %v78_v19  ;;  %81 = vst [vmem:[#allocation7 + $0x8] sm:$0xff] %v79_v20 }
  0x34   :  { %156 = shalt.err (!%p153_p6)
}
  0x35   :  { %s157_s8 = scalar_lea.hbm %s229_s2, 256 }
  0x36   :  { %p158_p7 = scmp.ne.s32.totalorder %s229_s2, %s157_s8  ;;  %p161_p8 = scmp.lt.u32.totalorder %s157_s8, %s229_s2 }
  0x38   :  { %p163_p9 = pnand %p161_p8, %p158_p7 }
  0x3a   :  { %166 = shalt.err (!%p163_p9)
}
  0x3b   :  { %91 = dma.vmem_to_hbm [thread:$0]  %s89_s4, 256, %s229_s2, [#allocation4]  }
  0x3c   :  { %171 = dma.done.wait [#allocation4], 256  }
  0x3d   :  { %172 = vsyncadd [#allocation4], 4294967040 }
  0x3e   :  { %95 = vsyncpa [#allocation3], 1 }
  0x3f   :  { %96 = vsyncpa [#allocation6], 1 }
  0x40   :  { %97 = vsyncpa [#allocation4], 1 }

</bundles_post_ra>
